<compile_context>
chip_gen: v6e
topology: v6e:2x2x1
jax: 0.10.0
libtpu: 0.0.40
codegen_flags: <defaults>
</compile_context>

<pallas_src>
import jax
import jax.numpy as jnp
from jax.experimental import pallas as pl
from jax.experimental.pallas import tpu as pltpu


def _detector_kernel(params_ref,      # SMEM f32[3] = (min_confidence, W, H)
                     boxes_ref,       # VMEM f32[8, T/2]  pair-packed xywh
                     scores_ref,      # VMEM f32[8, T/8]
                     out_boxes_ref,   # VMEM f32[8, T/2]  pair-packed xyxy
                     out_scores_ref,  # VMEM f32[8, T/8]  score if kept else 0
                     out_keep_ref,    # VMEM i8 [8, T/8]  1 if kept else 0
                     ):
    min_conf = params_ref[0]
    img_w = params_ref[1]
    img_h = params_ref[2]

    # ---- xywh (normalized) -> xyxy (pixel coords) on the pair-packed slab.
    # Rows are (x, y, w, h) of the even detection then (x, y, w, h) of the odd
    # detection of each lane column.  Rolling the slab down by 2 sublanes puts
    # (x, y) under the matching (w, h) rows, so one full-width add plus one
    # row-parity scaled multiply produce the entire xyxy slab and a single
    # unmasked full-tile store (no partial sublane stores).
    b = boxes_ref[...]                                     # (8, T/2)
    row = jax.lax.broadcasted_iota(jnp.int32, b.shape, 0)  # sublane index
    shifted = pltpu.roll(b, shift=2, axis=0)               # rows 2,3,6,7 <- x,y
    is_wh_row = (row & 2) != 0                             # rows 2,3,6,7 = (w,h)
    xyxy = b + jnp.where(is_wh_row, shifted, 0.0)          # x,y,x+w,y+h,...
    scale = jnp.where((row & 1) == 0, img_w, img_h)        # x-rows*W, y-rows*H
    out_boxes_ref[...] = xyxy * scale

    # ---- confidence threshold (result_to_detection filter).
    s = scores_ref[...]
    keep = s >= min_conf
    out_scores_ref[...] = jnp.where(keep, s, 0.0)
    out_keep_ref[...] = keep.astype(jnp.int8)


def _pick_tile(M, max_tile=131072):
    """Largest detection tile (multiple of 1024 so every lane block stays
    128-aligned) that divides M, capped at max_tile.  Prefers >= 4 grid steps
    (v7x: 2 TensorCores x >= 2 pipelined steps each), then >= 2, then 1."""
    assert M % 1024 == 0, "pad detection capacity M to a multiple of 1024"
    hi = min(max_tile, M)
    hi -= hi % 1024
    for min_steps in (4, 2, 1):
        for cand in range(hi, 0, -1024):
            if M % cand == 0 and M // cand >= min_steps:
                return cand
    return 1024  # unreachable given the assert above


def azure_detector_postprocess(boxes_xywh_p8, scores_p8, image_wh,
                               min_confidence=0.85, max_tile=131072):
    """Detection post-processing of AzureCognitiveDetector as one Pallas pass.

    boxes_xywh_p8: f32[8, M/2] pair-packed normalized boxes (see module header)
    scores_p8:     f32[8, M/8] sublane-dense confidences
    image_wh:      f32[2] = (W, H)
    Returns (boxes_xyxy_p8, keep_int8, scores_kept) in the same layouts.
    """
    assert boxes_xywh_p8.ndim == 2 and boxes_xywh_p8.shape[0] == 8
    M = 2 * boxes_xywh_p8.shape[1]
    assert M % 1024 == 0, "pad detection capacity M (B*N) to a multiple of 1024"
    assert scores_p8.shape == (8, M // 8), "scores and boxes disagree on M"

    tile = _pick_tile(M, max_tile)
    grid = (M // tile,)

    # All grid-invariant scalars live in one SMEM block: (min_conf, W, H).
    params = jnp.concatenate([
        jnp.asarray([min_confidence], dtype=jnp.float32),
        jnp.asarray(image_wh, dtype=jnp.float32).reshape(-1)[:2],
    ])

    out_boxes, out_scores, out_keep = pl.pallas_call(
        _detector_kernel,
        out_shape=(
            jax.ShapeDtypeStruct((8, M // 2), jnp.float32),   # boxes xyxy
            jax.ShapeDtypeStruct((8, M // 8), jnp.float32),   # scores kept
            jax.ShapeDtypeStruct((8, M // 8), jnp.int8),      # keep mask
        ),
        grid=grid,
        in_specs=[
            pl.BlockSpec(memory_space=pltpu.MemorySpace.SMEM),   # params
            pl.BlockSpec((8, tile // 2), lambda i: (0, i)),      # boxes
            pl.BlockSpec((8, tile // 8), lambda i: (0, i)),      # scores
        ],
        out_specs=(
            pl.BlockSpec((8, tile // 2), lambda i: (0, i)),      # boxes out
            pl.BlockSpec((8, tile // 8), lambda i: (0, i)),      # scores out
            pl.BlockSpec((8, tile // 8), lambda i: (0, i)),      # keep out
        ),
        compiler_params=pltpu.CompilerParams(
            dimension_semantics=("parallel",)),
    )(params, boxes_xywh_p8, scores_p8)

    # TODO(synk): the remote Azure analyze_image() call, ThreadPoolExecutor
    # fan-out, variable-length packing of only-kept detections, and the
    # output_names.index() label lookup have no Pallas equivalent; callers get
    # a fixed-capacity keep mask instead.
    return out_boxes, out_keep, out_scores


def pack_box_pairs(boxes_cm):
    """Demo-only relayout: component-major f32[4, M] -> pair-packed f32[8, M/2].
    Production producers should emit the packed layout directly."""
    return jnp.concatenate([boxes_cm[:, 0::2], boxes_cm[:, 1::2]], axis=0)


if __name__ == "__main__":
    key = jax.random.PRNGKey(0)
    B, N = 2, 2048                 # 2 images x 2048 candidate slots -> M = 4096
    M = B * N
    k1, k2 = jax.random.split(key)

    # Natural-layout test data: rows (x, y, w, h) normalized in [0, 0.5].
    boxes_nat = jax.random.uniform(k1, (4, M), dtype=jnp.float32) * 0.5
    scores_nat = jax.random.uniform(k2, (B, N), dtype=jnp.float32)
    image_wh = jnp.array([640.0, 480.0], dtype=jnp.float32)     # (W, H)
    min_confidence = 0.85

    # Pack into the kernel's I/O contract (demo-only relayout).
    boxes_p8 = pack_box_pairs(boxes_nat)            # f32[8, M/2]
    scores_p8 = scores_nat.reshape(8, M // 8)       # f32[8, M/8]

    boxes_xyxy_p8, keep_i8, scores_kept_p8 = jax.block_until_ready(
        azure_detector_postprocess(boxes_p8, scores_p8, image_wh,
                                   min_confidence=min_confidence))

    # ---- pure-JAX reference check -----------------------------------------
    W, H = image_wh[0], image_wh[1]
    x, y, w, h = (boxes_nat[i] for i in range(4))
    ref_nat = jnp.stack([x * W, y * H, (x + w) * W, (y + h) * H], axis=0)
    ref_boxes_p8 = pack_box_pairs(ref_nat)
    keep_nat = scores_nat >= min_confidence
    ref_keep_p8 = keep_nat.reshape(8, M // 8)
    ref_scores_p8 = jnp.where(keep_nat, scores_nat, 0.0).reshape(8, M // 8)

    assert boxes_xyxy_p8.shape == (8, M // 2)
    assert keep_i8.dtype == jnp.int8
    assert jnp.allclose(boxes_xyxy_p8, ref_boxes_p8, atol=1e-4)
    assert jnp.array_equal(keep_i8.astype(bool), ref_keep_p8)
    assert jnp.allclose(scores_kept_p8, ref_scores_p8, atol=1e-6)

    print("KERNEL_OK")
</pallas_src>

<mosaic_0001>
module attributes {stable_mosaic.version = 11 : i64} {
  func.func @_detector_kernel(%arg0: i32, %arg1: memref<3xf32, #tpu.memory_space<smem>>, %arg2: memref<8x512xf32, #tpu.memory_space<vmem>>, %arg3: memref<8x128xf32, #tpu.memory_space<vmem>>, %arg4: memref<8x512xf32, #tpu.memory_space<vmem>>, %arg5: memref<8x128xf32, #tpu.memory_space<vmem>>, %arg6: memref<8x128xi8, #tpu.memory_space<vmem>>) attributes {dimension_semantics = [#tpu.dimension_semantics<parallel>], iteration_bounds = array<i64: 4>, scalar_prefetch = 0 : i64, scratch_operands = 0 : i64, tpu.core_type = #tpu.core_type<tc>, window_params = [{transform_indices = @transform_0, window_bounds = array<i64: 3>}, {transform_indices = @transform_1, window_bounds = array<i64: 8, 512>}, {transform_indices = @transform_2, window_bounds = array<i64: 8, 128>}, {transform_indices = @transform_3, window_bounds = array<i64: 8, 512>}, {transform_indices = @transform_4, window_bounds = array<i64: 8, 128>}, {transform_indices = @transform_5, window_bounds = array<i64: 8, 128>}]} {
    %c0 = arith.constant 0 : index
    %0 = memref.load %arg1[%c0] : memref<3xf32, #tpu.memory_space<smem>>
    %c1 = arith.constant 1 : index
    %1 = memref.load %arg1[%c1] : memref<3xf32, #tpu.memory_space<smem>>
    %c2 = arith.constant 2 : index
    %2 = memref.load %arg1[%c2] : memref<3xf32, #tpu.memory_space<smem>>
    %c0_0 = arith.constant 0 : index
    %c0_1 = arith.constant 0 : index
    %3 = vector.load %arg2[%c0_0, %c0_1] : memref<8x512xf32, #tpu.memory_space<vmem>>, vector<8x512xf32>
    %4 = tpu.iota {dimensions = array<i32: 0>} : vector<8x512xi32>
    %c2_i32 = arith.constant 2 : i32
    %5 = tpu.dynamic_rotate %3 by %c2_i32 dim 0 : vector<8x512xf32>, i32 -> vector<8x512xf32>
    %c2_i32_2 = arith.constant 2 : i32
    %6 = vector.broadcast %c2_i32_2 : i32 to vector<8x512xi32>
    %7 = arith.andi %4, %6 : vector<8x512xi32>
    %c0_i32 = arith.constant 0 : i32
    %8 = vector.broadcast %c0_i32 : i32 to vector<8x512xi32>
    %9 = arith.cmpi ne, %7, %8 : vector<8x512xi32>
    %cst = arith.constant 0.000000e+00 : f32
    %10 = vector.broadcast %cst : f32 to vector<8x512xf32>
    %11 = arith.select %9, %5, %10 : vector<8x512xi1>, vector<8x512xf32>
    %12 = arith.addf %3, %11 : vector<8x512xf32>
    %c1_i32 = arith.constant 1 : i32
    %13 = vector.broadcast %c1_i32 : i32 to vector<8x512xi32>
    %14 = arith.andi %4, %13 : vector<8x512xi32>
    %c0_i32_3 = arith.constant 0 : i32
    %15 = vector.broadcast %c0_i32_3 : i32 to vector<8x512xi32>
    %16 = arith.cmpi eq, %14, %15 : vector<8x512xi32>
    %17 = vector.broadcast %1 : f32 to vector<8x512xf32>
    %18 = vector.broadcast %2 : f32 to vector<8x512xf32>
    %19 = arith.select %16, %17, %18 : vector<8x512xi1>, vector<8x512xf32>
    %20 = arith.mulf %12, %19 : vector<8x512xf32>
    %c0_4 = arith.constant 0 : index
    %c0_5 = arith.constant 0 : index
    %21 = vector.load %arg4[%c0_4, %c0_5] : memref<8x512xf32, #tpu.memory_space<vmem>>, vector<8x512xf32>
    tpu.vector_store %arg4[%c0_4, %c0_5], %20 {strides = array<i32>} : memref<8x512xf32, #tpu.memory_space<vmem>>, vector<8x512xf32>,
    %c0_6 = arith.constant 0 : index
    %c0_7 = arith.constant 0 : index
    %22 = vector.load %arg3[%c0_6, %c0_7] : memref<8x128xf32, #tpu.memory_space<vmem>>, vector<8x128xf32>
    %23 = vector.broadcast %0 : f32 to vector<8x128xf32>
    %24 = arith.cmpf oge, %22, %23 : vector<8x128xf32>
    %cst_8 = arith.constant 0.000000e+00 : f32
    %25 = vector.broadcast %cst_8 : f32 to vector<8x128xf32>
    %26 = arith.select %24, %22, %25 : vector<8x128xi1>, vector<8x128xf32>
    %c0_9 = arith.constant 0 : index
    %c0_10 = arith.constant 0 : index
    %27 = vector.load %arg5[%c0_9, %c0_10] : memref<8x128xf32, #tpu.memory_space<vmem>>, vector<8x128xf32>
    tpu.vector_store %arg5[%c0_9, %c0_10], %26 {strides = array<i32>} : memref<8x128xf32, #tpu.memory_space<vmem>>, vector<8x128xf32>,
    %28 = arith.extui %24 : vector<8x128xi1> to vector<8x128xi8>
    %c0_11 = arith.constant 0 : index
    %c0_12 = arith.constant 0 : index
    %29 = vector.load %arg6[%c0_11, %c0_12] : memref<8x128xi8, #tpu.memory_space<vmem>>, vector<8x128xi8>
    tpu.vector_store %arg6[%c0_11, %c0_12], %28 {strides = array<i32>} : memref<8x128xi8, #tpu.memory_space<vmem>>, vector<8x128xi8>,
    return
  }
  func.func @transform_0(%arg0: i32) -> i32 {
    %c0_i32 = arith.constant 0 : i32
    %c0_i32_0 = arith.constant 0 : i32
    return %c0_i32 : i32
  }
  func.func @transform_1(%arg0: i32) -> (i32, i32) {
    %c0_i32 = arith.constant 0 : i32
    %c0_i32_0 = arith.constant 0 : i32
    return %c0_i32, %arg0 : i32, i32
  }
  func.func @transform_2(%arg0: i32) -> (i32, i32) {
    %c0_i32 = arith.constant 0 : i32
    %c0_i32_0 = arith.constant 0 : i32
    return %c0_i32, %arg0 : i32, i32
  }
  func.func @transform_3(%arg0: i32) -> (i32, i32) {
    %c0_i32 = arith.constant 0 : i32
    %c0_i32_0 = arith.constant 0 : i32
    return %c0_i32, %arg0 : i32, i32
  }
  func.func @transform_4(%arg0: i32) -> (i32, i32) {
    %c0_i32 = arith.constant 0 : i32
    %c0_i32_0 = arith.constant 0 : i32
    return %c0_i32, %arg0 : i32, i32
  }
  func.func @transform_5(%arg0: i32) -> (i32, i32) {
    %c0_i32 = arith.constant 0 : i32
    %c0_i32_0 = arith.constant 0 : i32
    return %c0_i32, %arg0 : i32, i32
  }
}

</mosaic_0001>

<bundles_post_ra>
// kernel: tpu_custom_call.1
= control target key start
LH: loop header
LB: loop body
LE: loop exit
PB: predicated region body
PF: predicated region fallthrough
CT: control target
= control target key end

     0   :  { %11 = vsyncpa [#allocation5], 0  ;;  %s1232_s0 = inlined_call_operand.hbm [shape: f32[3], index: 0, kind: input, shape index: {}]   ;;  %s1233_s1 = inlined_call_operand.hbm [shape: f32[8,2048], index: 1, kind: input, shape index: {}]   ;;  %s1234_s2 = inlined_call_operand.hbm [shape: f32[8,512], index: 2, kind: input, shape index: {}]   ;;  %s1235_s3 = inlined_call_operand.hbm [shape: f32[8,2048], index: 3, kind: output, shape index: {0}]   ;;  %s1236_s4 = inlined_call_operand.hbm [shape: f32[8,512], index: 4, kind: output, shape index: {1}]   ;;  %s1237_s5 = inlined_call_operand.hbm [shape: s8[8,512], index: 5, kind: output, shape index: {2}]  }
   0x1   :  { %12 = vsyncpa [#allocation3], 0 }
   0x2   :  { %14 = vsyncpa [#allocation3 + $0x1], 0 }
   0x3   :  { %15 = vsyncpa [#allocation8], 0 }
   0x4   :  { %17 = vsyncpa [#allocation8 + $0x1], 0 }
   0x5   :  { %18 = vsyncpa [#allocation4], 0 }
   0x6   :  { %20 = vsyncpa [#allocation4 + $0x1], 0 }
   0x7   :  { %21 = vsyncpa [#allocation11], 0 }
   0x8   :  { %23 = vsyncpa [#allocation11 + $0x1], 0  ;;  %s910_s18 = smov 0   ;;  %s912_s19 = smov 0  }
   0x9   :  { %s914_s20 = smov 0   ;;  %s916_s21 = smov 0  }
   0xa LB: > { %s931_s22 = sadd.s32 4294967295, %s871_s21   ;;  %s1239_s23 = sadd.s32 4294967294, %s871_s21   ;;  %s871_s21 = sphi %s916_s21, %s1267_s21   ;;  %s867_s20 = sphi %s914_s20, %s1266_s20   ;;  %s863_s19 = sphi %s912_s19, %s1265_s19   ;;  %s859_s18 = sphi %s910_s18, %s1264_s18  }
   0xb   : > { %s935_s24 = sadd.s32 1, %s871_s21   ;;  %s57_s25 = sadd.s32 1, %s867_s20 }
   0xc   : > { %s54_s26 = ssub.s32 %s871_s21, %s935_s24  ;;  %p64_p0 = scmp.ne.s32.totalorder %s867_s20, %s863_s19 }
   0xd   : > { %p55_p1 = scmp.eq.s32.totalorder %s54_s26, 0  ;;  %p70_p2 = scmp.ne.s32.totalorder %s863_s19, %s859_s18 }
   0xe   : > { %p1238_p3 = scmp.eq.s32.totalorder %s931_s22, 0  ;;  %p120_p4 = scmp.eq.s32.totalorder %s931_s22, 3 }
   0xf   : > { %s947_s27 = scalar_select %p55_p1, %s867_s20, %s57_s25  }
  0x10   : > { %p951_p5 = por %p1238_p3, %p70_p2  ;;  %p958_p6 = por %p120_p4, %p64_p0 }
  0x11   : > { %p126_p7 = scmp.eq.s32.totalorder %s1239_s23, 3  ;;  %p575_p8 = scmp.ge.s32.totalorder %s871_s21, 1 }
  0x12   : > { %s1243_s28 = scalar_select %p951_p5, 1, 0 }
  0x13   : > { %s1244_s29 = scalar_select %p958_p6, 1, 0 }
  0x14   : > { %p185_p9 = scmp.lt.s32.totalorder %s871_s21, 5  ;;  %p966_p10 = por %p126_p7, %p70_p2 }
  0x15   : > { %p65_p12 = scmp.eq.s32.totalorder %s871_s21, 0  ;;  %p639_p13 = scmp.lt.s32.totalorder %s871_s21, 4 }
  0x16   : > { %s1245_s30 = scalar_select %p966_p10, 1, 0 }
  0x17   : > { %p970_p11 = pnand %p575_p8, %p185_p9  ;;  %s979_s7 = sand.u32 1, %s867_s20  }
  0x18   : > { %p66_p4 = por %p65_p12, %p64_p0  ;;  %s578_s8 = sshll.u32 %s979_s7, 5 }
  0x19   : > { %s1246_s6 = scalar_select %p970_p11, 1, 0 }
  0x1a   : > { %p617_p1 = pneg %p970_p11  ;;  %s601_s9 = sshll.u32 %s871_s21, 9 }
  0x1b   : > { %s991_s12 = scalar_lea.hbm %s1233_s1, %s601_s9  ;;  %s873_s13 = smov [#allocation2]  }
  0x1c   : > { %p618_p2 = pnand %p617_p1, %p1238_p3  ;;  %s211_s16 = scalar_lea.vmem [#allocation6], %s578_s8 }
  0x1d   : > { %s219_s17 = sshll.u32 %s211_s16, 4  ;;  %p996_p0 = pnand %p639_p13, %p66_p4  ;;  %s220_s17 = int_to_ptr.vmem [resolvable:$true] %s219_s17 }
  0x1e   : > { %620 = dma.hbm_to_smem (!%p618_p2), %s1232_s0, 16, %s873_s13, [#allocation5]  }
  0x1f   : > { %s208_s9 = scalar_lea.sflag [#allocation3], %s979_s7  ;;  %s687_s10 = scalar_lea.hbm %s991_s12, 512 }
  0x20   : > { %p688_p7 = scmp.ne.s32.totalorder %s991_s12, %s687_s10  ;;  %p689_p8 = pneg %p996_p0 }
  0x21   : > { %s692_s13 = scalar_lea.hbm %s1233_s1, 2048  ;;  %p693_p13 = scmp.lt.s32.totalorder %s991_s12, %s1233_s1 }
  0x22   : > { %p690_p9 = pnand %p689_p8, %p688_p7  ;;  %p694_p1 = scmp.lt.s32.totalorder %s692_s13, %s687_s10 }
  0x24   : > { %p691_p12 = pneg %p690_p9  ;;  %p695_p4 = por %p694_p1, %p693_p13 }
  0x26   : > { %p696_p2 = pnand %p695_p4, %p691_p12 }
  0x28   : > { %699 = shalt.err (!%p696_p2)
}
  0x29   : > { %s700_s16 = scalar_lea.vmem %s220_s17, 512  ;;  %s874_s23 = smov [#allocation6]  }
  0x2a   : > { %p701_p3 = scmp.ne.s32.totalorder %s220_s17, %s700_s16  ;;  %s705_s26 = sshll.u32 %s874_s23, 4  ;;  %s706_s26 = int_to_ptr.vmem [resolvable:$false] %s705_s26 }
  0x2b   : > { %s707_s11 = scalar_lea.vmem %s706_s26, 1024  ;;  %p708_p9 = scmp.lt.s32.totalorder %s220_s17, %s706_s26 }
  0x2c   : > { %p703_p10 = pnand %p701_p3, %p689_p8  ;;  %p709_p6 = scmp.lt.s32.totalorder %s707_s11, %s700_s16 }
  0x2e   : > { %p704_p7 = pneg %p703_p10  ;;  %p710_p5 = por %p709_p6, %p708_p9 }
  0x30   : > { %p711_p11 = pnand %p710_p5, %p704_p7 }
  0x32   : > { %714 = shalt.err (!%p711_p11)
}
  0x33   : > { %624 = dma.hbm_to_vmem [thread:$0]  (!%p996_p0), %s991_s12, 512, %s220_s17, %s208_s9  }
  0x34   : > { %s582_s10 = sshll.u32 %s871_s21, 7  ;;  %s1248_s14 = sshll.u32 %s979_s7, 3 }
  0x35   : > { %s1026_s23 = scalar_lea.hbm %s1234_s2, %s582_s10  ;;  %s230_s26 = scalar_lea.vmem [#allocation7], %s1248_s14 }
  0x36   : > { %s237_s15 = sshll.u32 %s230_s26, 4  ;;  %s227_s16 = scalar_lea.sflag [#allocation8], %s979_s7  ;;  %s238_s15 = int_to_ptr.vmem [resolvable:$true] %s237_s15 }
  0x37   : > { %s715_s11 = scalar_lea.hbm %s1026_s23, 128  ;;  %s720_s9 = scalar_lea.hbm %s1234_s2, 512 }
  0x38   : > { %p716_p3 = scmp.ne.s32.totalorder %s1026_s23, %s715_s11  ;;  %p721_p10 = scmp.lt.s32.totalorder %s1026_s23, %s1234_s2 }
  0x39   : > { %p722_p11 = scmp.lt.s32.totalorder %s720_s9, %s715_s11 }
  0x3a   : > { %p718_p5 = pnand %p716_p3, %p689_p8 }
  0x3b   : > { %p723_p12 = por %p722_p11, %p721_p10 }
  0x3c   : > { %p719_p6 = pneg %p718_p5 }
  0x3e   : > { %p724_p13 = pnand %p723_p12, %p719_p6 }
  0x40   : > { %727 = shalt.err (!%p724_p13)
}
  0x41   : > { %s728_s13 = scalar_lea.vmem %s238_s15, 128  ;;  %s875_s7 = smov [#allocation7]  }
  0x42   : > { %p729_p1 = scmp.ne.s32.totalorder %s238_s15, %s728_s13  ;;  %s733_s14 = sshll.u32 %s875_s7, 4  ;;  %s734_s14 = int_to_ptr.vmem [resolvable:$false] %s733_s14 }
  0x43   : > { %s735_s26 = scalar_lea.vmem %s734_s14, 256  ;;  %p736_p7 = scmp.lt.s32.totalorder %s238_s15, %s734_s14 }
  0x44   : > { %p731_p4 = pnand %p729_p1, %p689_p8  ;;  %p737_p9 = scmp.lt.s32.totalorder %s735_s26, %s728_s13 }
  0x46   : > { %p732_p2 = pneg %p731_p4  ;;  %p738_p3 = por %p737_p9, %p736_p7 }
  0x48   : > { %p739_p5 = pnand %p738_p3, %p732_p2 }
  0x4a   : > { %742 = shalt.err (!%p739_p5)
}
  0x4b   : > { %627 = dma.hbm_to_vmem [thread:$0]  (!%p996_p0), %s1026_s23, 128, %s238_s15, %s227_s16  }
  0x4c   : > { %p1249_p6 = scmp.ne.s32.totalorder %s1246_s6, 0 }
  0x4d   : > { %p1250_p10 = scmp.eq.s32.totalorder (!%p1249_p6), %s931_s22, 0 }
  0x4e   : > { %246 = sbr.rel (%p1249_p6) target bundleno = 169 (0xa9), region = 32 }
  0x53   : > { %838 = dma.done.wait (%p1250_p10), [#allocation5], 16   ;;  %p1251_p8 = pmov %p1250_p10 }
  0x54   : > { %s1056_s11 = sand.u32 1, %s863_s19   ;;  %p1252_p0 = scmp.ne.s32.totalorder %s1243_s28, 0 }
  0x55   : > { %840 = vsyncadd (%p1251_p8), [#allocation5], 4294967280  ;;  %s585_s12 = sshll.u32 %s1056_s11, 5  ;;  %s253_s25 = scalar_lea.sflag [#allocation3], %s1056_s11 }
  0x56   : > { %s256_s23 = scalar_lea.vmem [#allocation6], %s585_s12 }
  0x57   : > { %842 = dma.done.wait (%p1252_p0), %s253_s25, 512  }
  0x58   : > { %844 = vsyncadd (%p1252_p0), %s253_s25, 4294966784  ;;  %s586_s6 = sshll.u32 %s1056_s11, 3  ;;  %s262_s15 = scalar_lea.sflag [#allocation8], %s1056_s11 }
  0x59   : > { %s265_s16 = scalar_lea.vmem [#allocation7], %s586_s6 }
  0x5a   : > { %846 = dma.done.wait (%p1252_p0), %s262_s15, 128  }
  0x5b   : > { %848 = vsyncadd (%p1252_p0), %s262_s15, 4294967168 }
  0x5c   : > { %270 = sfence }
  0x5d   : > { %s312_s17 = sld [smem:[#allocation2]]  ;;  %v315_v0 = vld [vmem:[%s256_s23] sm:$0xff]  ;;  %v319_v1 = vlaneseq  ;;  %v316_v2 = vld [vmem:[%s256_s23 + $0x8] sm:$0xff]  ;;  %v317_v3 = vld [vmem:[%s256_s23 + $0x10] sm:$0xff]  ;;  %s1072_s9 = scalar_lea.vmem [#allocation10], %s586_s6  ;;  %v876_v29 = vmov 0  }
  0x5e   : > { %s395_s10 = sshll.u32 %s1072_s9, 4  ;;  %s1075_s8 = sld [smem:[#allocation2 + $0x1]]  ;;  %v318_v5 = vld [vmem:[%s256_s23 + $0x18] sm:$0xff]  ;;  %v321_v6 = vrot.slane %v315_v0, 6  ;;  %v322_v7 = vrot.slane %v316_v2, 6  ;;  %v323_v8 = vrot.slane %v317_v3, 6  ;;  %s1084_s10 = int_to_ptr.vmem [resolvable:$true] %s395_s10 }
  0x5f   : > { %v320_v4 = vshrl.u32 %v319_v1, 7  ;;  %s1077_s13 = sld [smem:[#allocation2 + $0x2]]  ;;  %s589_s28 = sshll.u32 %s1056_s11, 1  ;;  %v348_v9 = vld [vmem:[%s265_s16] sm:$0xff]  ;;  %v324_v12 = vrot.slane %v318_v5, 6 }
  0x60   : > { %s362_s7 = sand.u32 1, %s931_s22   ;;  %s1081_s14 = scalar_lea.vmem [#allocation12], %s589_s28 }
  0x61   : > { %v325_v10 = vand.u32 2, %v320_v4  ;;  %v335_v11 = vand.u32 1, %v320_v4  ;;  %s408_s26 = sshll.u32 %s1081_s14, 4  ;;  %s597_s25 = sshll.u32 %s931_s22, 7  ;;  %s1116_s26 = int_to_ptr.vmem [resolvable:$true] %s408_s26 }
  0x62   : > { %s1108_s15 = scalar_lea.hbm %s1236_s4, %s597_s25  ;;  %p1259_p12 = scmp.ne.s32.totalorder %s1244_s29, 0 }
  0x63   : > { %v349_v13 = vstv %s312_s17  ;;  %vm1086_vm0 = vcmp.ne.s32.totalorder %v325_v10, 0  ;;  %vm1090_vm1 = vcmp.eq.s32.totalorder %v335_v11, 0  ;;  %s1125_s17 = scalar_lea.vmem [#allocation9], %s585_s12  ;;  %s877_s28 = smov [#allocation10]  }
  0x64   : > { %vm1095_vm2 = vcmp.ge.f32.partialorder %v348_v9, %v349_v13  ;;  %v327_v17 = vsel %vm1086_vm0, %v321_v6, 0.0  ;;  %v328_v18 = vsel %vm1086_vm0, %v322_v7, 0.0  ;;  %v329_v19 = vsel %vm1086_vm0, %v323_v8, 0.0  ;;  %s747_s25 = sshll.u32 %s877_s28, 4  ;;  %s748_s25 = int_to_ptr.vmem [resolvable:$false] %s747_s25 }
  0x65   : > { %v351_v20 = vsel %vm1095_vm2, %v348_v9, 0.0  ;;  %v331_v21 = vadd.f32 %v327_v17, %v315_v0  ;;  %v337_v22 = vstv %s1075_s8  ;;  %v332_v23 = vadd.f32 %v328_v18, %v316_v2  ;;  %vm353_vm3 = vmpackc.low %vm1095_vm2, %vm1095_vm2  ;;  %s749_s12 = scalar_lea.vmem %s748_s25, 256  ;;  %p750_p4 = scmp.lt.s32.totalorder %s1084_s10, %s748_s25 }
  0x66   : > { %352 = vst [vmem:[%s1072_s9] sm:$0xff] %v351_v20  ;;  %v338_v24 = vstv %s1077_s13  ;;  %v333_v25 = vadd.f32 %v329_v19, %v317_v3  ;;  %v330_v26 = vsel %vm1086_vm0, %v324_v12, 0.0  ;;  %vm354_vm4 = vmpackc.even %vm353_vm3, %vm353_vm3  ;;  %s1132_s9 = scalar_lea.sflag [#allocation11], %s362_s7  ;;  %s743_s13 = scalar_lea.vmem %s1084_s10, 128 }
  0x67   : > { %v339_v27 = vsel %vm1090_vm1, %v337_v22, %v338_v24  ;;  %v334_v28 = vadd.f32 %v330_v26, %v318_v5  ;;  %v355_v30 = vsel %vm354_vm4, 16843009, %v876_v29  ;;  %p744_p11 = scmp.ne.s32.totalorder %s1084_s10, %s743_s13  ;;  %p751_p2 = scmp.lt.s32.totalorder %s749_s12, %s743_s13 }
  0x69   : > { %p745_p13 = pnand %p744_p11, %p1259_p12  ;;  %p752_p7 = por %p751_p2, %p750_p4 }
  0x6b   : > { %p746_p1 = pneg %p745_p13 }
  0x6d   : > { %p753_p9 = pnand %p752_p7, %p746_p1 }
  0x6f   : > { %756 = shalt.err (!%p753_p9)
}
  0x70   : > { %s757_s7 = scalar_lea.hbm %s1108_s15, 128  ;;  %s761_s28 = scalar_lea.hbm %s1236_s4, 512 }
  0x71   : > { %p758_p3 = scmp.ne.s32.totalorder %s1108_s15, %s757_s7  ;;  %p762_p10 = scmp.lt.s32.totalorder %s1108_s15, %s1236_s4 }
  0x72   : > { %p763_p8 = scmp.lt.s32.totalorder %s761_s28, %s757_s7 }
  0x73   : > { %p759_p5 = pnand %p758_p3, %p1259_p12 }
  0x74   : > { %p764_p0 = por %p763_p8, %p762_p10 }
  0x75   : > { %p760_p6 = pneg %p759_p5 }
  0x77   : > { %p765_p11 = pnand %p764_p0, %p760_p6 }
  0x79   : > { %768 = shalt.err (!%p765_p11)
}
  0x7a   : > { %612 = dma.vmem_to_hbm [thread:$0]  (%p1259_p12), %s1084_s10, 128, %s1108_s15, %s1132_s9   ;;  %v340_v31 = vmul.f32 %v339_v27, %v331_v21  ;;  %v341_v32 = vmul.f32 %v339_v27, %v332_v23  ;;  %v342_v33 = vmul.f32 %v339_v27, %v333_v25  ;;  %356 = vst [vmem:[%s1081_s14] sm:$0x3] %v355_v30  ;;  %v343_v34 = vmul.f32 %v339_v27, %v334_v28 }
  0x7b   : > { %s1260_s16 = sshll.u32 %s931_s22, 9  ;;  %s598_s12 = sshll.u32 %s931_s22, 5 }
  0x7c   : > { %s1161_s25 = scalar_lea.hbm %s1235_s3, %s1260_s16  ;;  %s1261_s7 = sshll.u32 %s1125_s17, 4  ;;  %344 = vst [vmem:[%s1125_s17] sm:$0xff] %v340_v31  ;;  %345 = vst [vmem:[%s1125_s17 + $0x8] sm:$0xff] %v341_v32  ;;  %s1166_s7 = int_to_ptr.vmem [resolvable:$true] %s1261_s7 }
  0x7d   : > { %s406_s10 = scalar_lea.hbm %s1237_s5, %s598_s12  ;;  %346 = vst [vmem:[%s1125_s17 + $0x10] sm:$0xff] %v342_v33  ;;  %s769_s14 = scalar_lea.vmem %s1116_s26, 32 }
  0x7e   : > { %p770_p13 = scmp.ne.s32.totalorder %s1116_s26, %s769_s14  ;;  %s878_s15 = smov [#allocation12]  }
  0x7f   : > { %s773_s28 = sshll.u32 %s878_s15, 4  ;;  %s774_s28 = int_to_ptr.vmem [resolvable:$false] %s773_s28 }
  0x80   : > { %p771_p1 = pnand %p770_p13, %p1259_p12  ;;  %s775_s22 = scalar_lea.vmem %s774_s28, 64 }
  0x81   : > { %p776_p2 = scmp.lt.s32.totalorder %s1116_s26, %s774_s28  ;;  %p777_p7 = scmp.lt.s32.totalorder %s775_s22, %s769_s14 }
  0x82   : > { %p772_p4 = pneg %p771_p1 }
  0x83   : > { %p778_p9 = por %p777_p7, %p776_p2 }
  0x85   : > { %p779_p3 = pnand %p778_p9, %p772_p4 }
  0x87   : > { %782 = shalt.err (!%p779_p3)
}
  0x88   : > { %s783_s16 = scalar_lea.hbm %s406_s10, 32  ;;  %s787_s12 = scalar_lea.hbm %s1237_s5, 128 }
  0x89   : > { %p784_p5 = scmp.ne.s32.totalorder %s406_s10, %s783_s16  ;;  %p788_p8 = scmp.lt.s32.totalorder %s406_s10, %s1237_s5 }
  0x8a   : > { %p789_p0 = scmp.lt.s32.totalorder %s787_s12, %s783_s16 }
  0x8b   : > { %p785_p6 = pnand %p784_p5, %p1259_p12 }
  0x8c   : > { %p790_p11 = por %p789_p0, %p788_p8 }
  0x8d   : > { %p786_p10 = pneg %p785_p6 }
  0x8f   : > { %p791_p13 = pnand %p790_p11, %p786_p10 }
  0x91   : > { %794 = shalt.err (!%p791_p13)
}
  0x92   : > { %613 = dma.vmem_to_hbm [thread:$0]  (%p1259_p12), %s1116_s26, 32, %s406_s10, %s1132_s9   ;;  %347 = vst [vmem:[%s1125_s17 + $0x18] sm:$0xff] %v343_v34 }
  0x93   : > { %s358_s14 = scalar_lea.sflag [#allocation4], %s1056_s11  ;;  %s795_s15 = scalar_lea.vmem %s1166_s7, 512 }
  0x94   : > { %p796_p1 = scmp.ne.s32.totalorder %s1166_s7, %s795_s15  ;;  %s879_s28 = smov [#allocation9]  }
  0x95   : > { %s799_s22 = sshll.u32 %s879_s28, 4  ;;  %s800_s22 = int_to_ptr.vmem [resolvable:$false] %s799_s22 }
  0x96   : > { %p797_p4 = pnand %p796_p1, %p1259_p12  ;;  %s801_s16 = scalar_lea.vmem %s800_s22, 1024 }
  0x97   : > { %p802_p7 = scmp.lt.s32.totalorder %s1166_s7, %s800_s22  ;;  %p803_p9 = scmp.lt.s32.totalorder %s801_s16, %s795_s15 }
  0x98   : > { %p798_p2 = pneg %p797_p4 }
  0x99   : > { %p804_p3 = por %p803_p9, %p802_p7 }
  0x9b   : > { %p805_p5 = pnand %p804_p3, %p798_p2 }
  0x9d   : > { %808 = shalt.err (!%p805_p5)
}
  0x9e   : > { %s809_s26 = scalar_lea.hbm %s1161_s25, 512  ;;  %s813_s9 = scalar_lea.hbm %s1235_s3, 2048 }
  0x9f   : > { %p810_p6 = scmp.ne.s32.totalorder %s1161_s25, %s809_s26  ;;  %p814_p0 = scmp.lt.s32.totalorder %s1161_s25, %s1235_s3 }
  0xa0   : > { %p815_p11 = scmp.lt.s32.totalorder %s813_s9, %s809_s26 }
  0xa1   : > { %p811_p10 = pnand %p810_p6, %p1259_p12 }
  0xa2   : > { %p816_p13 = por %p815_p11, %p814_p0 }
  0xa3   : > { %p812_p8 = pneg %p811_p10 }
  0xa5   : > { %p817_p1 = pnand %p816_p13, %p812_p8 }
  0xa7   : > { %820 = shalt.err (!%p817_p1)
}
  0xa8   : > { %611 = dma.vmem_to_hbm [thread:$0]  (%p1259_p12), %s1166_s7, 512, %s1161_s25, %s358_s14  }
  0xa9 PF: > { %p641_p4 = scmp.ge.s32.totalorder %s871_s21, 2  ;;  %s420_s13 = sand.u32 1, %s859_s18  }
  0xaa   : > { %p1262_p2 = scmp.ne.s32.totalorder %s1245_s30, 0  ;;  %s421_s12 = scalar_lea.sflag [#allocation4], %s420_s13 }
  0xac   : > { %p629_p7 = pnand %p641_p4, %p1262_p2 }
  0xae   : > { %p630_p9 = pneg %p629_p7 }
  0xb0   : > { %850 = dma.done.wait (%p630_p9), %s421_s12, 512  }
  0xb1   : > { %852 = vsyncadd (%p630_p9), %s421_s12, 4294966784  ;;  %s1263_s23 = sadd.s32 4294967294, %s871_s21  }
  0xb2   : > { %s429_s6 = sand.u32 1, %s1263_s23  }
  0xb3   : > { %s430_s15 = scalar_lea.sflag [#allocation11], %s429_s6 }
  0xb4   : > { %854 = dma.done.wait (%p630_p9), %s430_s15, 160  }
  0xb5   : > { %856 = vsyncadd (%p630_p9), %s430_s15, 4294967136  ;;  %p26_p12 = scmp.ge.s32.totalorder %s935_s24, 6   ;;  %s1264_s18 = smov %s863_s19 }
  0xb6   : > { %s1265_s19 = smov %s867_s20  ;;  %s1266_s20 = smov %s947_s27 }
  0xb7   : > { %s1267_s21 = smov %s935_s24  ;;  %28 = sbr.rel (!%p26_p12) target bundleno = 10 (0xa), region = 127 }
  0xbc   :  { %444 = vsyncpa [#allocation3], 1 }
  0xbd   :  { %446 = vsyncpa [#allocation3 + $0x1], 1 }
  0xbe   :  { %447 = vsyncpa [#allocation8], 1 }
  0xbf   :  { %449 = vsyncpa [#allocation8 + $0x1], 1 }
  0xc0   :  { %450 = vsyncpa [#allocation4], 1 }
  0xc1   :  { %452 = vsyncpa [#allocation4 + $0x1], 1 }
  0xc2   :  { %453 = vsyncpa [#allocation11], 1 }
  0xc3   :  { %455 = vsyncpa [#allocation11 + $0x1], 1 }
  0xc4   :  { %456 = vsyncpa [#allocation5], 1 }
  0xc5   :  { %458 = vsyncpa [#allocation5 + $0x1], 1 }

</bundles_post_ra>
